<compile_context>
chip_gen: v7x
topology: tpu7x:2x2x1
jax: 0.10.0
libtpu: 0.0.40
codegen_flags: <defaults>
</compile_context>

<pallas_src>
import functools

import numpy as np
import jax
import jax.numpy as jnp
from jax import lax
from jax.experimental import pallas as pl
from jax.experimental.pallas import tpu as pltpu


_LANE = 128


def _vmem_budgets():
    """Per-chip (block_budget_bytes, vmem_limit_bytes).

    v5e / v6e have 128 MiB physical VMEM -> stream large blocks (fewer ~0.35 us
    grid steps, wide tiles reach a higher fraction of the HBM roofline).
    v7x has 64 MiB per TensorCore, so double-buffered blocks + the resident
    accumulator must stay well under that.
    """
    phys = 64 * 1024 * 1024                      # conservative default == v7x
    try:
        info = pltpu.get_tpu_info()
        for attr in ("vmem_capacity_bytes", "vmem_bytes", "vmem_size_bytes"):
            val = getattr(info, attr, None)
            if val:
                phys = int(val)
                break
    except Exception:
        pass
    if phys >= 128 * 1024 * 1024:                # v5e / v6e
        return 28 * 1024 * 1024, 112 * 1024 * 1024
    return 12 * 1024 * 1024, 44 * 1024 * 1024    # v7x


_BLOCK_BUDGET_BYTES, _VMEM_LIMIT_BYTES = _vmem_budgets()


def _choose_tile(total, bytes_per_col):
    """Largest lane-aligned tile along the reduction axis within the block budget."""
    if total <= _LANE or total * bytes_per_col <= _BLOCK_BUDGET_BYTES:
        return total                                        # full-extent block is always legal
    tile = max(_LANE, (_BLOCK_BUDGET_BYTES // bytes_per_col) // _LANE * _LANE)
    return min(tile, (total // _LANE) * _LANE)               # lane-aligned, <= total


def _check_vmem_fit(tag, est_bytes):
    # Loud check instead of a silent VMEM OOM / pipelining collapse (hits v7x first).
    if est_bytes > _VMEM_LIMIT_BYTES:
        raise ValueError(
            f"{tag}: estimated VMEM footprint {est_bytes / 2**20:.1f} MiB exceeds "
            f"vmem_limit_bytes={_VMEM_LIMIT_BYTES / 2**20:.1f} MiB; the untiled dims "
            f"(batch N and/or channels C) are too large for this kernel.")


def _scale_by_diag(g, out_dtype):
    """out_ij = G_ij * rsqrt(G_ii) * rsqrt(G_jj)  (row-normalized gram).

    Finalize-only: the (N,N) eye-mask + reductions run once per kernel call
    (negligible next to the streamed reduction) and avoid a degenerate
    (N,1)->(1,N) transpose.  Rows with zero norm give rsqrt(0)=inf -> NaN,
    matching the PyTorch reference (division by a zero norm).
    """
    n = g.shape[0]
    eye = (lax.broadcasted_iota(jnp.int32, (n, n), 0)
           == lax.broadcasted_iota(jnp.int32, (n, n), 1))
    gd = jnp.where(eye, g, 0.0)
    diag_col = jnp.sum(gd, axis=1, keepdims=True)            # (N,1) = ||sm_i||^2
    diag_row = jnp.sum(gd, axis=0, keepdims=True)            # (1,N) without a transpose
    return (g * lax.rsqrt(diag_col) * lax.rsqrt(diag_row)).astype(out_dtype)


# ---------------------------------------------------------------------------
# Kernel 1: fused [adaptive-avg-pool(1,1) -> flatten -> L2 row-norm -> gram]
#   grid over the flattened spatial axis (HW); acc_ref holds spatial SUMs.
#   x_ref : (N, C, hw_tile)   input dtype (f32 or bf16)
#   o_ref : (N, N)            output dtype
#   acc   : (N, C)            f32 scratch, resident across the grid
# ---------------------------------------------------------------------------
def _pool_gram_kernel(x_ref, o_ref, acc_ref, *, hw_total, hw_tile, inv_hw):
    k = pl.program_id(0)
    last = pl.num_programs(0) - 1

    @pl.when(k == 0)
    def _init():
        acc_ref[...] = jnp.zeros_like(acc_ref)

    def _accumulate(x):
        # Partial spatial SUM in f32 (bf16 tiles are cast per-tile so HBM traffic
        # keeps the bf16 advantage).  One cross-lane reduce per step hides under DMA.
        acc_ref[...] += jnp.sum(x.astype(jnp.float32), axis=2)

    if hw_total % hw_tile != 0:                               # static: ragged tail exists
        # Masking (iota + compare + select) only executes on the LAST grid step;
        # every other step takes the unmasked fast path.
        @pl.when(k != last)
        def _body():
            _accumulate(x_ref[...])

        @pl.when(k == last)
        def _tail():
            x = x_ref[...]
            col = k * hw_tile + lax.broadcasted_iota(jnp.int32, (1, 1, hw_tile), 2)
            _accumulate(jnp.where(col < hw_total, x, 0.0))
    else:
        _accumulate(x_ref[...])

    @pl.when(k == last)
    def _finalize():
        # inv_hw is mathematically redundant (the normalization below is
        # scale-invariant); kept only as an f32 overflow guard for huge H*W.
        sm = acc_ref[...] * inv_hw                            # (N, C) pooled features
        diag = jnp.sum(sm * sm, axis=1, keepdims=True)        # ||sm_i||^2  (no eye-mask)
        m = sm * lax.rsqrt(diag)                              # row-normalize
        g = lax.dot_general(m, m, (((1,), (1,)), ((), ())),   # m @ m.T (NT matmul on MXU)
                            preferred_element_type=jnp.float32)
        o_ref[...] = g.astype(o_ref.dtype)


# ---------------------------------------------------------------------------
# Kernel 2: fused [L2 row-norm -> gram] for already-2D inputs
#   grid over D; acc_ref accumulates partial grams on the MXU.
#   x_ref : (N, d_tile)   input dtype (f32 or bf16, fed to the MXU natively)
#   o_ref : (N, N)        output dtype
#   acc   : (N, N)        f32 scratch
# ---------------------------------------------------------------------------
def _gram_kernel(x_ref, o_ref, acc_ref, *, d_total, d_tile):
    k = pl.program_id(0)
    last = pl.num_programs(0) - 1

    @pl.when(k == 0)
    def _init():
        acc_ref[...] = jnp.zeros_like(acc_ref)

    def _accumulate(x):
        # Native-dtype operands (bf16 stays bf16) with f32 accumulation on the MXU.
        acc_ref[...] += lax.dot_general(x, x, (((1,), (1,)), ((), ())),
                                        preferred_element_type=jnp.float32)

    if d_total % d_tile != 0:                                 # static: ragged tail exists
        @pl.when(k != last)
        def _body():
            _accumulate(x_ref[...])

        @pl.when(k == last)
        def _tail():
            x = x_ref[...]
            col = k * d_tile + lax.broadcasted_iota(jnp.int32, (1, d_tile), 1)
            _accumulate(jnp.where(col < d_total, x, 0.0))
    else:
        _accumulate(x_ref[...])

    @pl.when(k == last)
    def _finalize():
        o_ref[...] = _scale_by_diag(acc_ref[...], o_ref.dtype)


# ---------------------------------------------------------------------------
# Wrappers (jitted per shape/dtype; tile overrides are static for testing)
# ---------------------------------------------------------------------------
def _prep_dtype(x):
    """Kernel compute dtypes are f32 / bf16 (MXU-native); everything else is upcast."""
    if x.dtype == jnp.float32 or x.dtype == jnp.bfloat16:
        return x, x.dtype
    out_dtype = x.dtype if jnp.issubdtype(x.dtype, jnp.floating) else jnp.float32
    return x.astype(jnp.float32), out_dtype


@functools.partial(jax.jit, static_argnames=("hw_tile",))
def _pool_gram(x_nchw, hw_tile=None):
    x_nchw, out_dtype = _prep_dtype(x_nchw)
    n, c, h, w = x_nchw.shape
    hw = h * w
    x3 = x_nchw.reshape(n, c, hw)                             # glue reshape only (outside kernel)
    itemsize = x3.dtype.itemsize
    if hw_tile is None:
        hw_tile = _choose_tile(hw, n * c * itemsize)
    grid = (pl.cdiv(hw, hw_tile),)
    out_itemsize = jnp.dtype(out_dtype).itemsize
    _check_vmem_fit("pool_gram",
                    2 * n * c * hw_tile * itemsize            # double-buffered input block
                    + n * c * 4                               # f32 accumulator scratch
                    + 2 * n * n * out_itemsize)               # output (double-buffered)
    kernel = functools.partial(_pool_gram_kernel, hw_total=hw, hw_tile=hw_tile,
                               inv_hw=1.0 / float(hw))
    return pl.pallas_call(
        kernel,
        out_shape=jax.ShapeDtypeStruct((n, n), out_dtype),
        grid=grid,
        in_specs=[pl.BlockSpec((n, c, hw_tile), lambda k: (0, 0, k))],
        out_specs=pl.BlockSpec((n, n), lambda k: (0, 0)),
        scratch_shapes=[pltpu.VMEM((n, c), jnp.float32)],
        compiler_params=pltpu.CompilerParams(
            dimension_semantics=("arbitrary",),
            vmem_limit_bytes=_VMEM_LIMIT_BYTES),
        cost_estimate=pl.CostEstimate(
            flops=n * c * hw + 2 * n * n * c,
            transcendentals=n,
            bytes_accessed=n * c * hw * itemsize + n * n * out_itemsize),
    )(x3)


@functools.partial(jax.jit, static_argnames=("d_tile",))
def _gram(x2d, d_tile=None):
    x2d, out_dtype = _prep_dtype(x2d)
    n, d = x2d.shape
    itemsize = x2d.dtype.itemsize
    if d_tile is None:
        d_tile = _choose_tile(d, n * itemsize)
    grid = (pl.cdiv(d, d_tile),)
    out_itemsize = jnp.dtype(out_dtype).itemsize
    _check_vmem_fit("gram",
                    2 * n * d_tile * itemsize                 # double-buffered input block
                    + n * n * 4                               # f32 gram accumulator
                    + 2 * n * n * out_itemsize)               # output (double-buffered)
    kernel = functools.partial(_gram_kernel, d_total=d, d_tile=d_tile)
    return pl.pallas_call(
        kernel,
        out_shape=jax.ShapeDtypeStruct((n, n), out_dtype),
        grid=grid,
        in_specs=[pl.BlockSpec((n, d_tile), lambda k: (0, k))],
        out_specs=pl.BlockSpec((n, n), lambda k: (0, 0)),
        scratch_shapes=[pltpu.VMEM((n, n), jnp.float32)],
        compiler_params=pltpu.CompilerParams(
            dimension_semantics=("arbitrary",),
            vmem_limit_bytes=_VMEM_LIMIT_BYTES),
        cost_estimate=pl.CostEstimate(
            flops=2 * n * n * d,
            transcendentals=n,
            bytes_accessed=n * d * itemsize + n * n * out_itemsize),
    )(x2d)


def tensor_matrix(tensor):
    """Pallas equivalent of Kernel_VIS.tensor_matrix."""
    if tensor.ndim == 4:
        return _pool_gram(tensor)
    return _gram(tensor)


def kernel_vis_forward(tensor_list):
    """Pallas equivalent of Kernel_VIS.forward: returns a list of numpy arrays."""
    outs = [tensor_matrix(t) for t in tensor_list]
    outs = jax.block_until_ready(outs)
    return [np.asarray(jax.device_get(o)) for o in outs]      # mirrors .cpu().numpy()


# ---------------------------------------------------------------------------
# Pure-numpy reference for sanity checks
# ---------------------------------------------------------------------------
def _ref_tensor_matrix(t):
    t = np.asarray(t, dtype=np.float32)
    if t.ndim == 4:
        sm = t.mean(axis=(2, 3))
    else:
        sm = t
    norm = np.sqrt((sm ** 2).sum(axis=1, keepdims=True))
    m = sm / norm
    return m @ m.T


if __name__ == "__main__":
    key = jax.random.PRNGKey(0)
    k1, k2, k3, k4, k5 = jax.random.split(key, 5)

    # Small inputs consistent with the module: one 4-D NCHW activation, one 2-D feature.
    x4d = jax.random.normal(k1, (2, 4, 16, 16), dtype=jnp.float32)   # (N, C, H, W)
    x2d = jax.random.normal(k2, (2, 32), dtype=jnp.float32)          # (N, D)

    outs = kernel_vis_forward([x4d, x2d])
    refs = [_ref_tensor_matrix(np.asarray(x4d)), _ref_tensor_matrix(np.asarray(x2d))]
    for got, ref in zip(outs, refs):
        assert got.shape == ref.shape
        np.testing.assert_allclose(got, ref, rtol=1e-5, atol=1e-5)

    # Tiled-reduction path: multiple grid steps + masked ragged tail block (the mask
    # is gated to the last step), with forced small tiles so the pipelined code path
    # is validated at small shapes.
    x4d_b = jax.random.normal(k3, (4, 8, 20, 20), dtype=jnp.float32)   # HW=400, tile=128 -> 4 steps
    x2d_b = jax.random.normal(k4, (4, 300), dtype=jnp.float32)         # D=300,  tile=128 -> 3 steps
    got4 = np.asarray(jax.block_until_ready(_pool_gram(x4d_b, hw_tile=128)))
    got2 = np.asarray(jax.block_until_ready(_gram(x2d_b, d_tile=128)))
    np.testing.assert_allclose(got4, _ref_tensor_matrix(np.asarray(x4d_b)), rtol=1e-5, atol=1e-5)
    np.testing.assert_allclose(got2, _ref_tensor_matrix(np.asarray(x2d_b)), rtol=1e-5, atol=1e-5)

    # bf16 inputs: the 2-D path feeds the MXU the native bf16 operand (f32 accumulate);
    # output is bf16, so compare at bf16-level tolerance against the f32 reference.
    x2d_bf = jax.random.normal(k5, (2, 256), dtype=jnp.bfloat16)
    got_bf = np.asarray(jax.block_until_ready(_gram(x2d_bf))).astype(np.float32)
    ref_bf = _ref_tensor_matrix(np.asarray(x2d_bf).astype(np.float32))
    np.testing.assert_allclose(got_bf, ref_bf, rtol=3e-2, atol=3e-2)

    print("KERNEL_OK")
</pallas_src>

<mosaic_0001>
module attributes {stable_mosaic.version = 11 : i64} {
  func.func @_pool_gram_kernel(%arg0: i32, %arg1: memref<2x4x256xf32, #tpu.memory_space<vmem>>, %arg2: memref<2x2xf32, #tpu.memory_space<vmem>>, %arg3: memref<2x4xf32, #tpu.memory_space<vmem>>) attributes {dimension_semantics = [#tpu.dimension_semantics<arbitrary>], iteration_bounds = array<i64: 1>, scalar_prefetch = 0 : i64, scratch_operands = 1 : i64, tpu.core_type = #tpu.core_type<tc>, window_params = [{transform_indices = @transform_0, window_bounds = array<i64: 2, 4, 256>}, {pipeline_mode = #tpu.pipeline_mode<synchronous>, transform_indices = @transform_1, window_bounds = array<i64: 2, 2>}]} {
    %c0_i32 = arith.constant 0 : i32
    %0 = arith.cmpi eq, %arg0, %c0_i32 : i32
    %1 = arith.extui %0 : i1 to i32
    %c0_i32_0 = arith.constant 0 : i32
    %2 = arith.cmpi ne, %1, %c0_i32_0 : i32
    scf.if %2 {
      %cst_9 = arith.constant 0.000000e+00 : f32
      %11 = vector.broadcast %cst_9 : f32 to vector<2x4xf32>
      %c0_10 = arith.constant 0 : index
      %c0_11 = arith.constant 0 : index
      %12 = vector.load %arg3[%c0_10, %c0_11] : memref<2x4xf32, #tpu.memory_space<vmem>>, vector<2x4xf32>
      tpu.vector_store %arg3[%c0_10, %c0_11], %11 {strides = array<i32>} : memref<2x4xf32, #tpu.memory_space<vmem>>, vector<2x4xf32>,
    } else {
    }
    %c0 = arith.constant 0 : index
    %c0_1 = arith.constant 0 : index
    %c0_2 = arith.constant 0 : index
    %3 = vector.load %arg1[%c0, %c0_1, %c0_2] : memref<2x4x256xf32, #tpu.memory_space<vmem>>, vector<2x4x256xf32>
    %c0_3 = arith.constant 0 : index
    %c0_4 = arith.constant 0 : index
    %4 = vector.load %arg3[%c0_3, %c0_4] : memref<2x4xf32, #tpu.memory_space<vmem>>, vector<2x4xf32>
    %cst = arith.constant dense<0.000000e+00> : vector<2x4xf32>
    %5 = vector.multi_reduction <add>, %3, %cst [2] : vector<2x4x256xf32> to vector<2x4xf32>
    %6 = arith.addf %4, %5 : vector<2x4xf32>
    %c0_5 = arith.constant 0 : index
    %c0_6 = arith.constant 0 : index
    %7 = vector.load %arg3[%c0_5, %c0_6] : memref<2x4xf32, #tpu.memory_space<vmem>>, vector<2x4xf32>
    tpu.vector_store %arg3[%c0_5, %c0_6], %6 {strides = array<i32>} : memref<2x4xf32, #tpu.memory_space<vmem>>, vector<2x4xf32>,
    %c0_i32_7 = arith.constant 0 : i32
    %8 = arith.cmpi eq, %arg0, %c0_i32_7 : i32
    %9 = arith.extui %8 : i1 to i32
    %c0_i32_8 = arith.constant 0 : i32
    %10 = arith.cmpi ne, %9, %c0_i32_8 : i32
    scf.if %10 {
      %c0_9 = arith.constant 0 : index
      %c0_10 = arith.constant 0 : index
      %11 = vector.load %arg3[%c0_9, %c0_10] : memref<2x4xf32, #tpu.memory_space<vmem>>, vector<2x4xf32>
      %cst_11 = arith.constant 3.906250e-03 : f32
      %12 = vector.broadcast %cst_11 : f32 to vector<2x4xf32>
      %13 = arith.mulf %11, %12 : vector<2x4xf32>
      %14 = arith.mulf %13, %13 : vector<2x4xf32>
      %cst_12 = arith.constant dense<0.000000e+00> : vector<2xf32>
      %15 = vector.multi_reduction <add>, %14, %cst_12 [1] : vector<2x4xf32> to vector<2xf32>
      %16 = vector.shape_cast %15 : vector<2xf32> to vector<2x1xf32>
      %17 = math.rsqrt %16 : vector<2x1xf32>
      %18 = vector.broadcast %17 : vector<2x1xf32> to vector<2x4xf32>
      %19 = arith.mulf %13, %18 : vector<2x4xf32>
      %cst_13 = arith.constant dense<0.000000e+00> : vector<2x2xf32>
      %20 = tpu.matmul %19, %19, %cst_13 {dimension_numbers = #tpu.dot_dimension_numbers<[1], [1], [0], [0], [0, 0, 1, 0], [], []>} : vector<2x4xf32>, vector<2x4xf32>, vector<2x2xf32> -> vector<2x2xf32>
      %c0_14 = arith.constant 0 : index
      %c0_15 = arith.constant 0 : index
      %21 = vector.load %arg2[%c0_14, %c0_15] : memref<2x2xf32, #tpu.memory_space<vmem>>, vector<2x2xf32>
      tpu.vector_store %arg2[%c0_14, %c0_15], %20 {strides = array<i32>} : memref<2x2xf32, #tpu.memory_space<vmem>>, vector<2x2xf32>,
    } else {
    }
    return
  }
  func.func @transform_0(%arg0: i32) -> (i32, i32, i32) {
    %c0_i32 = arith.constant 0 : i32
    %c0_i32_0 = arith.constant 0 : i32
    %c0_i32_1 = arith.constant 0 : i32
    return %c0_i32, %c0_i32_0, %arg0 : i32, i32, i32
  }
  func.func @transform_1(%arg0: i32) -> (i32, i32) {
    %c0_i32 = arith.constant 0 : i32
    %c0_i32_0 = arith.constant 0 : i32
    %c0_i32_1 = arith.constant 0 : i32
    return %c0_i32, %c0_i32_0 : i32, i32
  }
}

</mosaic_0001>

<bundles_post_ra>
// kernel: _pool_gram.1
= control target key start
LH: loop header
LB: loop body
LE: loop exit
PB: predicated region body
PF: predicated region fallthrough
CT: control target
= control target key end

     0   :  { %vm24_vm0 = vcmask 1043456   ;;  %s228_s0 = inlined_call_operand.vmem [shape: f32[2,4,256], index: 0, kind: input, shape index: {}]   ;;  %s229_s1 = inlined_call_operand.hbm [shape: f32[2,2], index: 1, kind: output, shape index: {}]  }
   0x1   :  { %v15_v0 = vld [vmem:[%s228_s0] sm:$0xff]  ;;  %v16_v1 = vld [vmem:[%s228_s0 + $0x8] sm:$0xff] }
   0x2   :  { %6 = vsyncpa [#allocation4], 0  ;;  %v20_v2 = vcombine.high %v15_v0, %v15_v0  ;;  %v25_v3 = vsel %vm24_vm0, %v15_v0, 0.0  ;;  %v21_v4 = vcombine.high %v16_v1, %v16_v1  ;;  %v30_v6 = vsel %vm24_vm0, %v16_v1, 0.0  ;;  %s196_s0 = smov [#allocation3]  }
   0x3   :  { %vm13_vm1 = vcmask 25600   ;;  %v194_v10 = vmov 0.0   ;;  %v37_v11 = vlaneseq  ;;  %vm47_vm2 = vcmask 1041409   ;;  %s146_s10 = sshll.u32 %s196_s0, 4  ;;  %s147_s10 = int_to_ptr.vmem [resolvable:$true] %s146_s10 }
   0x4   :  { %v26_v5 = vsel %vm24_vm0, %v20_v2, 0.0  ;;  %v31_v7 = vsel %vm24_vm0, %v21_v4, 0.0  ;;  %14 = vst.msk [vmem:[#allocation2] sm:$0x3] %vm13_vm1, %v194_v10  ;;  %158 = vmatprep.subr.mxu0 %v194_v10  ;;  %vm195_vm3 = vmmov 0   ;;  %vm64_vm4 = vcmask 31744   ;;  %p175_p1 = scmp.lt.s32.totalorder %s147_s10, %s147_s10 }
   0x5   :  { %v27_v8 = vadd.f32 %v26_v5, %v25_v3  ;;  %v32_v9 = vadd.f32 %v31_v7, %v30_v6  ;;  %v38_v12 = vand.u32 127, %v37_v11  ;;  %v40_v13 = vshrl.u32 %v37_v11, 7  ;;  %160 = vmatprep.mubr.msk.f32.mxu0 %vm195_vm3, %v194_v10  ;;  %s170_s11 = scalar_lea.vmem %s147_s10, 32 }
   0x6   :  { %vm138_vm5 = vcmask 9216   ;;  %p171_p0 = scmp.ne.s32.totalorder %s147_s10, %s170_s11  ;;  %p176_p2 = scmp.lt.s32.totalorder %s170_s11, %s170_s11 }
   0x7   :  { %28 = vadd.xlane.f32.xlu0 %v27_v8  ;;  %v41_v15 = vsub.s32 %v38_v12, %v40_v13 }
   0x8   :  { %p177_p3 = por %p176_p2, %p175_p1 }
   0xa   :  { %p178_p4 = pnand %p177_p3, %p171_p0 }
   0xb   :  { %33 = vadd.xlane.f32.xlu0 %v32_v9  ;;  %v17_v19 = vld [vmem:[#allocation2] sm:$0x3] }
  0x94   :  { %v29_v14 = vpop.xlane.xlu0 %28 }
  0x95   :  { %v42_v17 = vrot.slane %v29_v14, %v41_v15 }
  0x98   :  { %v34_v16 = vpop.xlane.xlu0 %33 }
  0x99   :  { %v46_v18 = vrot.slane %v34_v16, %v41_v15 }
  0x9b   :  { %v48_v20 = vsel %vm47_vm2, %v46_v18, %v42_v17 }
  0x9c   :  { %v50_v21 = vadd.f32 %v48_v20, %v17_v19 }
  0x9e   :  { %52 = vst.msk [vmem:[#allocation2] sm:$0x3] %vm13_vm1, %v50_v21 }
  0xa5   :  { %v56_v22 = vld [vmem:[#allocation2] sm:$0x3] }
  0xa6   :  { %v57_v23 = vmul.f32 0.00390625, %v56_v22 }
  0xa8   :  { %v58_v24 = vmul.f32 %v57_v23, %v57_v23 }
  0xaa   :  { %v59_v25 = vsel %vm13_vm1, %v58_v24, 0.0 }
  0xab   :  { %60 = vadd.xlane.f32.xlu1 %v59_v25 }
 0x138   :  { %v61_v26 = vpop.xlane.xlu1 %60 }
 0x139   :  { %168 = vrsqrt.f32 %v61_v26 }
 0x143   :  { %v169_v27 = vpop.eup %168 }
 0x144   :  { %v63_v28 = vmul.f32 %v169_v27, %v57_v23 }
 0x146   :  { %159 = vmatpush3.xpose.msk.msra.mxu0 %vm64_vm4, %v63_v28 }
 0x149   :  { %161 = vmatmul.mubr.msk.f32.vlgmr.msra.gmra.mrb[0].mxu0 %vm64_vm4, %v63_v28 }
 0x21c   :  { %v134_v29 = vpop.f32.mrb[0].mxu0 }
 0x21d   :  { %139 = vst.msk [vmem:[#allocation3] sm:$0x3] %vm138_vm5, %v134_v29  ;;  %v162_v30 = vpop.f32.mrb[1].mxu0 }
 0x21e   :  { %181 = shalt.err (!%p178_p4)
}
 0x21f   :  { %s182_s14 = scalar_lea.hbm %s229_s1, 32 }
 0x220   :  { %p183_p5 = scmp.ne.s32.totalorder %s229_s1, %s182_s14  ;;  %p186_p6 = scmp.lt.u32.totalorder %s182_s14, %s229_s1 }
 0x222   :  { %p188_p7 = pnand %p186_p6, %p183_p5 }
 0x224   :  { %191 = shalt.err (!%p188_p7)
}
 0x225   :  { %149 = dma.vmem_to_hbm [thread:$0]  %s147_s10, 32, %s229_s1, [#allocation4]  }
 0x226   :  { %192 = dma.done.wait [#allocation4], 32  }
 0x227   :  { %193 = vsyncadd [#allocation4], 4294967264 }
 0x228   :  { %153 = vsyncpa [#allocation4], 1 }

</bundles_post_ra>
